<compile_context>
chip_gen: v5e
topology: v5e:2x2
jax: 0.10.0
libtpu: 0.0.40
codegen_flags: <defaults>
</compile_context>

<pallas_src>
import functools

import jax
import jax.numpy as jnp
from jax.experimental import pallas as pl
from jax.experimental.pallas import tpu as pltpu

# Correlation matrix from SoftCrossEntropyLoss.get_soft_label(dataset='gid')
GID_COR_MATRIX = [
    [0.70233585, 0.06005314, 0.05826753, 0.05912497, 0.0601325, 0.06008601],
    [0.05828811, 0.68169336, 0.06528714, 0.06380056, 0.06505968, 0.06587114],
    [0.05661636, 0.065358, 0.68243323, 0.06391395, 0.06816525, 0.06351321],
    [0.05734087, 0.06374903, 0.0637931, 0.68114282, 0.06806151, 0.06591267],
    [0.05792765, 0.06457202, 0.06758096, 0.06760595, 0.67658365, 0.06572976],
    [0.05823144, 0.0657711, 0.063348, 0.06586576, 0.06612559, 0.6806581],
]


def _soft_ce_kernel(mat_ref, pred_ref, lbl_ref, out_ref, *, hw):
    """One grid step: a (C, T) logits tile -> one f32 partial sum.

    mat_ref : (C, C+1) fused per-label weight matrix.  Column r (r < C) is the
              combined soft+hard class weight for hard label r; column C is the
              fallback for labels outside [0, C) (e.g. the mmseg 255 label).
    pred_ref: (C, T) logits, classes on sublanes, pixels on lanes.
    lbl_ref : (1, T) int32 hard labels.
    out_ref : (1, 1) f32 partial sum of  sum_c logp[c, p] * weight[c, p].
    """
    i = pl.program_id(1)

    pred = pred_ref[...].astype(jnp.float32)          # (C, T)
    lbl = lbl_ref[...]                                 # (1, T) int32
    C, T = pred.shape

    # log-softmax over the class (sublane) axis.
    m = jnp.max(pred, axis=0, keepdims=True)                         # (1, T)
    shifted = pred - m
    lse = jnp.log(jnp.sum(jnp.exp(shifted), axis=0, keepdims=True))  # (1, T)
    logp = shifted - lse                                             # (C, T)

    # Fused per-pixel weight column: one explicit label broadcast, then a single
    # C-iteration compare/select chain against the fused matrix columns.
    lbl_b = jnp.broadcast_to(lbl, (C, T))
    w = jnp.broadcast_to(mat_ref[:, C:C + 1], (C, T))     # out-of-range default
    for r in range(C):
        w = jnp.where(lbl_b == r, mat_ref[:, r:r + 1], w)  # (C, T)

    contrib = logp * w                                     # (C, T)

    def _reduce(x):
        s = jnp.sum(x, axis=0, keepdims=True)              # sublane reduce (1, T)
        return jnp.sum(s, axis=1, keepdims=True)           # lane reduce    (1, 1)

    if hw % T != 0:
        last = pl.num_programs(1) - 1

        @pl.when(i == last)
        def _():
            # Lanes past H*W on the final partial tile hold undefined data;
            # select (not multiply) so garbage/NaN logits cannot leak in.
            pix = i * T + jax.lax.broadcasted_iota(jnp.int32, (1, T), 1)
            out_ref[...] = _reduce(jnp.where(pix < hw, contrib, 0.0))

        @pl.when(i != last)
        def _():
            out_ref[...] = _reduce(contrib)
    else:
        out_ref[...] = _reduce(contrib)


def _round_up(x, m):
    return ((x + m - 1) // m) * m


def _fused_weight_matrix(loss_weight, ignore_index, dtype=jnp.float32):
    """(C, C+1): column r = loss_weight*cor[r] + (1-loss_weight)*e_r (hard CE),
    with the hard part zeroed for r == ignore_index; column C = loss_weight*cor[0]
    (out-of-range labels: soft term uses row 0, hard term contributes 0)."""
    cor = jnp.asarray(GID_COR_MATRIX, dtype)               # (C, C), row r = soft label for class r
    C = cor.shape[0]
    fused = loss_weight * cor.T                            # column r = loss_weight * cor[r]
    hard = jnp.eye(C, dtype=dtype)                         # column r = e_r
    if 0 <= ignore_index < C:
        hard = hard.at[ignore_index, ignore_index].set(0.0)
    fused = fused + (1.0 - loss_weight) * hard
    oob = (loss_weight * cor[0]).reshape(C, 1)
    return jnp.concatenate([fused, oob], axis=1)           # (C, C+1)


def soft_cross_entropy_loss(cls_score, label, *, loss_weight=1.0,
                            ignore_index=-100, max_tile_hw=65536):
    """Pallas implementation of SoftCrossEntropyLoss.forward (default config).

    cls_score: (N, C, H, W) float logits (NCHW, like PyTorch).
    label    : (N, H, W) int labels.
    Returns a scalar float32 loss.
    """
    N, C, H, W = cls_score.shape
    assert C == len(GID_COR_MATRIX), "gid correlation matrix expects 6 classes"
    HW = H * W
    P = N * HW

    # NCHW is already class-on-sublane / pixel-on-lane: only free reshapes here.
    pred = cls_score.reshape(N, C, HW)
    lbl = label.reshape(N, 1, HW).astype(jnp.int32)
    mat = _fused_weight_matrix(float(loss_weight), int(ignore_index))

    tile_hw = min(_round_up(HW, 128), max_tile_hw)
    num_tiles = pl.cdiv(HW, tile_hw)

    kernel = functools.partial(_soft_ce_kernel, hw=HW)

    cost = pl.CostEstimate(
        flops=int(P) * 10 * C,
        transcendentals=int(P) * (C + 1),
        bytes_accessed=int(P) * (C * cls_score.dtype.itemsize + 4)
        + N * num_tiles * 4 + int(mat.size) * 4,
    )

    partials = pl.pallas_call(
        kernel,
        out_shape=jax.ShapeDtypeStruct((N, num_tiles, 1, 1), jnp.float32),
        grid=(N, num_tiles),
        in_specs=[
            # fused weight matrix: whole (C, C+1) array, resident in VMEM
            pl.BlockSpec((C, C + 1), lambda n, i: (0, 0)),
            # logits: (C, tile_hw) tile, batch dim squeezed away
            pl.BlockSpec((None, C, tile_hw), lambda n, i: (n, 0, i)),
            # labels: (1, tile_hw) tile
            pl.BlockSpec((None, 1, tile_hw), lambda n, i: (n, 0, i)),
        ],
        # one f32 partial per (batch, pixel-tile) grid step
        out_specs=pl.BlockSpec((None, None, 1, 1), lambda n, i: (n, i, 0, 0)),
        compiler_params=pltpu.CompilerParams(
            dimension_semantics=("parallel", "parallel"),
            vmem_limit_bytes=32 * 1024 * 1024),
        cost_estimate=cost,
    )(mat, pred, lbl)

    # Both terms are averaged over label.numel() (avg_non_ignore=False, 'mean').
    return -jnp.sum(partials) / jnp.float32(P)


def _reference(cls_score, label, *, loss_weight, ignore_index=-100):
    """Pure-JAX reference mirroring the PyTorch forward (same edge semantics)."""
    cor = jnp.asarray(GID_COR_MATRIX, dtype=jnp.float32)
    N, C, H, W = cls_score.shape
    logp = jax.nn.log_softmax(cls_score.astype(jnp.float32), axis=1)  # (N,C,H,W)

    in_range = jnp.logical_and(label >= 0, label < C)
    valid = jnp.logical_and(in_range, label != ignore_index).astype(jnp.float32)
    onehot = jax.nn.one_hot(jnp.clip(label, 0, C - 1), C, axis=1, dtype=jnp.float32)
    ce = -jnp.sum(onehot * logp, axis=1) * valid
    loss_cls = (1.0 - loss_weight) * ce.sum() / label.size

    soft_idx = jnp.where(in_range, label, 0)
    soft = jnp.transpose(cor[soft_idx], (0, 3, 1, 2))                 # (N,C,H,W)
    loss_soft = loss_weight * (-jnp.mean(jnp.sum(soft * logp, axis=1)))
    return loss_cls + loss_soft


if __name__ == "__main__":
    key = jax.random.PRNGKey(0)
    k1, k2, k3 = jax.random.split(key, 3)

    N, C, H, W = 2, 6, 16, 16          # gid dataset -> 6 classes
    cls_score = jax.random.normal(k1, (N, C, H, W), dtype=jnp.float32)
    label = jax.random.randint(k2, (N, H, W), 0, C, dtype=jnp.int32)
    # Sprinkle some 255s (mmseg ignore label) to exercise the soft-label remap
    # and the hard-CE ignore path.
    label = jnp.where(jax.random.uniform(k3, (N, H, W)) < 0.05, 255, label)

    loss_weight = 0.7                  # exercise both the hard-CE and soft terms

    loss = soft_cross_entropy_loss(cls_score, label, loss_weight=loss_weight)
    loss = jax.block_until_ready(loss)

    ref = jax.block_until_ready(_reference(cls_score, label, loss_weight=loss_weight))

    if not bool(jnp.allclose(loss, ref, rtol=1e-5, atol=1e-5)):
        raise AssertionError(f"mismatch: pallas={loss} ref={ref}")

    print("KERNEL_OK")
</pallas_src>

<mosaic_0001>
module attributes {stable_mosaic.version = 11 : i64} {
  func.func @_soft_ce_kernel(%arg0: i32, %arg1: i32, %arg2: memref<6x7xf32, #tpu.memory_space<vmem>>, %arg3: memref<1x6x256xf32, #tpu.memory_space<vmem>>, %arg4: memref<1x1x256xi32, #tpu.memory_space<vmem>>, %arg5: memref<1x1x1x1xf32, #tpu.memory_space<vmem>>) attributes {dimension_semantics = [#tpu.dimension_semantics<parallel>, #tpu.dimension_semantics<parallel>], iteration_bounds = array<i64: 2, 1>, scalar_prefetch = 0 : i64, scratch_operands = 0 : i64, tpu.core_type = #tpu.core_type<tc>, window_params = [{pipeline_mode = #tpu.pipeline_mode<synchronous>, transform_indices = @transform_0, window_bounds = array<i64: 6, 7>}, {transform_indices = @transform_1, window_bounds = array<i64: 1, 6, 256>}, {transform_indices = @transform_2, window_bounds = array<i64: 1, 1, 256>}, {transform_indices = @transform_3, window_bounds = array<i64: 1, 1, 1, 1>}]} {
    %c0 = arith.constant 0 : index
    %c0_0 = arith.constant 0 : index
    %c0_1 = arith.constant 0 : index
    %0 = vector.load %arg3[%c0, %c0_0, %c0_1] : memref<1x6x256xf32, #tpu.memory_space<vmem>>, vector<1x6x256xf32>
    %1 = vector.shape_cast %0 : vector<1x6x256xf32> to vector<6x256xf32>
    %c0_2 = arith.constant 0 : index
    %c0_3 = arith.constant 0 : index
    %c0_4 = arith.constant 0 : index
    %2 = vector.load %arg4[%c0_2, %c0_3, %c0_4] : memref<1x1x256xi32, #tpu.memory_space<vmem>>, vector<1x1x256xi32>
    %3 = vector.shape_cast %2 : vector<1x1x256xi32> to vector<1x256xi32>
    %cst = arith.constant dense<0xFF800000> : vector<256xf32>
    %4 = vector.multi_reduction <maximumf>, %1, %cst [0] : vector<6x256xf32> to vector<256xf32>
    %5 = vector.shape_cast %4 : vector<256xf32> to vector<1x256xf32>
    %6 = vector.broadcast %5 : vector<1x256xf32> to vector<6x256xf32>
    %7 = arith.subf %1, %6 : vector<6x256xf32>
    %8 = math.exp %7 : vector<6x256xf32>
    %cst_5 = arith.constant dense<0.000000e+00> : vector<256xf32>
    %9 = vector.multi_reduction <add>, %8, %cst_5 [0] : vector<6x256xf32> to vector<256xf32>
    %10 = vector.shape_cast %9 : vector<256xf32> to vector<1x256xf32>
    %11 = math.log %10 : vector<1x256xf32>
    %12 = vector.broadcast %11 : vector<1x256xf32> to vector<6x256xf32>
    %13 = arith.subf %7, %12 : vector<6x256xf32>
    %14 = vector.shape_cast %3 : vector<1x256xi32> to vector<1x256xi32>
    %15 = vector.broadcast %14 : vector<1x256xi32> to vector<6x256xi32>
    %c0_6 = arith.constant 0 : index
    %c6 = arith.constant 6 : index
    %16 = vector.load %arg2[%c0_6, %c6] : memref<6x7xf32, #tpu.memory_space<vmem>>, vector<6x1xf32>
    %17 = vector.shape_cast %16 : vector<6x1xf32> to vector<6x1xf32>
    %18 = vector.broadcast %17 : vector<6x1xf32> to vector<6x256xf32>
    %c0_i32 = arith.constant 0 : i32
    %19 = vector.broadcast %c0_i32 : i32 to vector<6x256xi32>
    %20 = arith.cmpi eq, %15, %19 : vector<6x256xi32>
    %c0_7 = arith.constant 0 : index
    %c0_8 = arith.constant 0 : index
    %21 = vector.load %arg2[%c0_7, %c0_8] : memref<6x7xf32, #tpu.memory_space<vmem>>, vector<6x1xf32>
    %22 = vector.shape_cast %21 : vector<6x1xf32> to vector<6x1xf32>
    %23 = vector.broadcast %22 : vector<6x1xf32> to vector<6x256xf32>
    %24 = arith.select %20, %23, %18 : vector<6x256xi1>, vector<6x256xf32>
    %c1_i32 = arith.constant 1 : i32
    %25 = vector.broadcast %c1_i32 : i32 to vector<6x256xi32>
    %26 = arith.cmpi eq, %15, %25 : vector<6x256xi32>
    %c0_9 = arith.constant 0 : index
    %c1 = arith.constant 1 : index
    %27 = vector.load %arg2[%c0_9, %c1] : memref<6x7xf32, #tpu.memory_space<vmem>>, vector<6x1xf32>
    %28 = vector.shape_cast %27 : vector<6x1xf32> to vector<6x1xf32>
    %29 = vector.broadcast %28 : vector<6x1xf32> to vector<6x256xf32>
    %30 = arith.select %26, %29, %24 : vector<6x256xi1>, vector<6x256xf32>
    %c2_i32 = arith.constant 2 : i32
    %31 = vector.broadcast %c2_i32 : i32 to vector<6x256xi32>
    %32 = arith.cmpi eq, %15, %31 : vector<6x256xi32>
    %c0_10 = arith.constant 0 : index
    %c2 = arith.constant 2 : index
    %33 = vector.load %arg2[%c0_10, %c2] : memref<6x7xf32, #tpu.memory_space<vmem>>, vector<6x1xf32>
    %34 = vector.shape_cast %33 : vector<6x1xf32> to vector<6x1xf32>
    %35 = vector.broadcast %34 : vector<6x1xf32> to vector<6x256xf32>
    %36 = arith.select %32, %35, %30 : vector<6x256xi1>, vector<6x256xf32>
    %c3_i32 = arith.constant 3 : i32
    %37 = vector.broadcast %c3_i32 : i32 to vector<6x256xi32>
    %38 = arith.cmpi eq, %15, %37 : vector<6x256xi32>
    %c0_11 = arith.constant 0 : index
    %c3 = arith.constant 3 : index
    %39 = vector.load %arg2[%c0_11, %c3] : memref<6x7xf32, #tpu.memory_space<vmem>>, vector<6x1xf32>
    %40 = vector.shape_cast %39 : vector<6x1xf32> to vector<6x1xf32>
    %41 = vector.broadcast %40 : vector<6x1xf32> to vector<6x256xf32>
    %42 = arith.select %38, %41, %36 : vector<6x256xi1>, vector<6x256xf32>
    %c4_i32 = arith.constant 4 : i32
    %43 = vector.broadcast %c4_i32 : i32 to vector<6x256xi32>
    %44 = arith.cmpi eq, %15, %43 : vector<6x256xi32>
    %c0_12 = arith.constant 0 : index
    %c4 = arith.constant 4 : index
    %45 = vector.load %arg2[%c0_12, %c4] : memref<6x7xf32, #tpu.memory_space<vmem>>, vector<6x1xf32>
    %46 = vector.shape_cast %45 : vector<6x1xf32> to vector<6x1xf32>
    %47 = vector.broadcast %46 : vector<6x1xf32> to vector<6x256xf32>
    %48 = arith.select %44, %47, %42 : vector<6x256xi1>, vector<6x256xf32>
    %c5_i32 = arith.constant 5 : i32
    %49 = vector.broadcast %c5_i32 : i32 to vector<6x256xi32>
    %50 = arith.cmpi eq, %15, %49 : vector<6x256xi32>
    %c0_13 = arith.constant 0 : index
    %c5 = arith.constant 5 : index
    %51 = vector.load %arg2[%c0_13, %c5] : memref<6x7xf32, #tpu.memory_space<vmem>>, vector<6x1xf32>
    %52 = vector.shape_cast %51 : vector<6x1xf32> to vector<6x1xf32>
    %53 = vector.broadcast %52 : vector<6x1xf32> to vector<6x256xf32>
    %54 = arith.select %50, %53, %48 : vector<6x256xi1>, vector<6x256xf32>
    %55 = arith.mulf %13, %54 : vector<6x256xf32>
    %cst_14 = arith.constant dense<0.000000e+00> : vector<256xf32>
    %56 = vector.multi_reduction <add>, %55, %cst_14 [0] : vector<6x256xf32> to vector<256xf32>
    %57 = vector.shape_cast %56 : vector<256xf32> to vector<1x256xf32>
    %cst_15 = arith.constant dense<0.000000e+00> : vector<1xf32>
    %58 = vector.multi_reduction <add>, %57, %cst_15 [1] : vector<1x256xf32> to vector<1xf32>
    %59 = vector.shape_cast %58 : vector<1xf32> to vector<1x1xf32>
    %c0_16 = arith.constant 0 : index
    %c0_17 = arith.constant 0 : index
    %c0_18 = arith.constant 0 : index
    %c0_19 = arith.constant 0 : index
    %60 = vector.load %arg5[%c0_16, %c0_17, %c0_18, %c0_19] : memref<1x1x1x1xf32, #tpu.memory_space<vmem>>, vector<1x1x1x1xf32>
    %61 = vector.shape_cast %60 : vector<1x1x1x1xf32> to vector<1x1xf32>
    %62 = vector.shape_cast %59 : vector<1x1xf32> to vector<1x1x1x1xf32>
    tpu.vector_store %arg5[%c0_16, %c0_17, %c0_18, %c0_19], %62 {strides = array<i32>} : memref<1x1x1x1xf32, #tpu.memory_space<vmem>>, vector<1x1x1x1xf32>,
    return
  }
  func.func @transform_0(%arg0: i32, %arg1: i32) -> (i32, i32) {
    %c0_i32 = arith.constant 0 : i32
    %c0_i32_0 = arith.constant 0 : i32
    %c0_i32_1 = arith.constant 0 : i32
    return %c0_i32, %c0_i32_0 : i32, i32
  }
  func.func @transform_1(%arg0: i32, %arg1: i32) -> (i32, i32, i32) {
    %c0_i32 = arith.constant 0 : i32
    %c0_i32_0 = arith.constant 0 : i32
    return %arg0, %c0_i32, %arg1 : i32, i32, i32
  }
  func.func @transform_2(%arg0: i32, %arg1: i32) -> (i32, i32, i32) {
    %c0_i32 = arith.constant 0 : i32
    %c0_i32_0 = arith.constant 0 : i32
    return %arg0, %c0_i32, %arg1 : i32, i32, i32
  }
  func.func @transform_3(%arg0: i32, %arg1: i32) -> (i32, i32, i32, i32) {
    %c0_i32 = arith.constant 0 : i32
    %c0_i32_0 = arith.constant 0 : i32
    %c0_i32_1 = arith.constant 0 : i32
    return %arg0, %arg1, %c0_i32, %c0_i32_0 : i32, i32, i32, i32
  }
}

</mosaic_0001>

<bundles_post_ra>
// kernel: tpu_custom_call.1
= control target key start
LH: loop header
LB: loop body
LE: loop exit
PB: predicated region body
PF: predicated region fallthrough
CT: control target
= control target key end

     0   :  { %s552_s12 = smov 0   ;;  %s554_s13 = smov 0   ;;  %s614_s0 = inlined_call_operand.vmem [shape: f32[6,7], index: 0, kind: input, shape index: {}]   ;;  %s615_s1 = inlined_call_operand.vmem [shape: f32[2,6,256], index: 1, kind: input, shape index: {}]   ;;  %s616_s2 = inlined_call_operand.vmem [shape: s32[2,1,256], index: 2, kind: input, shape index: {}]   ;;  %s617_s3 = inlined_call_operand.vmem [shape: f32[2,1,1,1], index: 3, kind: output, shape index: {}]  }
   0x1   :  { %s556_s14 = smov 0  }
   0x2 LB: > { %s25_s15 = sadd.s32 1, %s519_s13  ;;  %p447_p0 = scmp.ge.s32.totalorder %s523_s14, 1  ;;  %s523_s14 = sphi %s556_s14, %s13_s14   ;;  %s519_s13 = sphi %s554_s13, %s619_s13   ;;  %s515_s12 = sphi %s552_s12, %s618_s12  }
   0x3   : > { %p27_p1 = scmp.ge.s32.totalorder %s25_s15, 2  ;;  %p174_p2 = scmp.lt.s32.totalorder %s523_s14, 3 }
   0x5   : > { %s621_s15 = smov (%p27_p1, %s25_s15), 0  ;;  %p175_p3 = pnand %p447_p0, %p174_p2 }
   0x6   : > { %p212_p4 = scmp.lt.s32.totalorder (!%p175_p3), %s515_s12, 1 }
   0x7   : > { %178 = sbr.rel (%p175_p3) target bundleno = 282 (0x11a), region = 32 }
   0xc   : > { %v282_v0 = vld [vmem:[%s614_s0] sm:$0x3f]  ;;  %v525_v1 = vmov 1   ;;  %v526_v2 = vmov 6   ;;  %v527_v3 = vmov 3   ;;  %v528_v4 = vmov 2  }
   0xd   : > { %487 = vset.pattern.permute.xlu1 %v525_v1  ;;  %485 = vset.pattern.permute.xlu0 %v526_v2  ;;  %v529_v5 = vmov 0   ;;  %v530_v6 = vmov 4   ;;  %v531_v7 = vmov 5   ;;  %s623_s12 = smov (!%p212_p4, %s515_s12), 1  ;;  %vm239_vm0 = vcmask 1045504  }
   0xe   : > { %299 = vperm.xlu1 %487, %v282_v0   ;;  %285 = vperm.xlu0 %485, %v282_v0   ;;  %s453_s18 = sshll.u32 %s623_s12, 4  ;;  %s450_s22 = sshll.u32 %s623_s12, 1  ;;  %vm355_vm13 = vcmask 0  }
   0xf   : > { %489 = vset.pattern.permute.xlu2 %v527_v3  ;;  %s219_s21 = scalar_lea.vmem %s615_s1, %s453_s18  ;;  %s228_s25 = scalar_lea.vmem %s616_s2, %s450_s22 }
  0x10   : > { %315 = vperm.xlu2 %489, %v282_v0   ;;  %v236_v8 = vld [vmem:[%s219_s21] sm:$0x3f]  ;;  %v237_v9 = vld [vmem:[%s219_s21 + $0x8] sm:$0x3f]  ;;  %s235_s28 = scalar_lea.vmem %s617_s3, %s623_s12 }
  0x11   : > { %v240_v10 = vsel %vm239_vm0, %v236_v8, -inf  ;;  %v247_v11 = vsel %vm239_vm0, %v237_v9, -inf  ;;  %v238_v46 = vld [vmem:[%s228_s25] sm:$0x3] }
  0x12   : > { %v241_v12 = vrot.slane %v240_v10, 4  ;;  %v248_v13 = vrot.slane %v247_v11, 4  ;;  %v280_v47 = vperm.slane %v238_v46, 0  ;;  %v281_v48 = vperm.slane %v238_v46, 1 }
  0x14   : > { %v242_v14 = vmax.f32 %v240_v10, %v241_v12  ;;  %v249_v15 = vmax.f32 %v247_v11, %v248_v13  ;;  %vm288_vm1 = vcmp.eq.s32.totalorder %v280_v47, 0  ;;  %vm289_vm2 = vcmp.eq.s32.totalorder %v281_v48, 0 }
  0x15   : > { %vm296_vm3 = vcmp.eq.s32.totalorder %v280_v47, 1  ;;  %vm297_vm4 = vcmp.eq.s32.totalorder %v281_v48, 1  ;;  %vm304_vm5 = vcmp.eq.s32.totalorder %v280_v47, 2  ;;  %vm305_vm6 = vcmp.eq.s32.totalorder %v281_v48, 2 }
  0x16   : > { %488 = vset.pattern.permute.xlu1 %v528_v4  ;;  %486 = vset.pattern.permute.xlu0 %v529_v5  ;;  %v243_v16 = vrot.slane %v242_v14, 2  ;;  %v250_v17 = vrot.slane %v249_v15, 2  ;;  %vm312_vm7 = vcmp.eq.s32.totalorder %v280_v47, 3  ;;  %vm313_vm8 = vcmp.eq.s32.totalorder %v281_v48, 3 }
  0x17   : > { %307 = vperm.xlu1 %488, %v282_v0   ;;  %291 = vperm.xlu0 %486, %v282_v0   ;;  %vm320_vm9 = vcmp.eq.s32.totalorder %v280_v47, 4  ;;  %vm321_vm10 = vcmp.eq.s32.totalorder %v281_v48, 4  ;;  %vm328_vm11 = vcmp.eq.s32.totalorder %v280_v47, 5  ;;  %vm329_vm12 = vcmp.eq.s32.totalorder %v281_v48, 5 }
  0x18   : > { %490 = vset.pattern.permute.xlu2 %v530_v6  ;;  %v244_v18 = vmax.f32 %v242_v14, %v243_v16  ;;  %v251_v19 = vmax.f32 %v249_v15, %v250_v17 }
  0x19   : > { %323 = vperm.xlu2 %490, %v282_v0  }
  0x1a   : > { %v245_v20 = vrot.slane %v244_v18, 1  ;;  %v252_v21 = vrot.slane %v251_v19, 1 }
  0x1c   : > { %v246_v22 = vmax.f32 %v244_v18, %v245_v20  ;;  %v253_v23 = vmax.f32 %v251_v19, %v252_v21 }
  0x1e   : > { %v585_v24 = vsub.f32 %v236_v8, %v246_v22  ;;  %v587_v25 = vsub.f32 %v237_v9, %v253_v23 }
  0x1f   : > { %491 = vset.pattern.permute.xlu1 %v531_v7  ;;  %492 = vset.pattern.permute.xlu0 %v531_v7 }
  0x20   : > { %331 = vperm.xlu1 %491, %v282_v0   ;;  %v256_v26 = vmul.f32 1.442695, %v585_v24  ;;  %v258_v27 = vmul.f32 1.442695, %v587_v25 }
  0x22   : > { %493 = vpow2.f32 %v256_v26 }
  0x23   : > { %495 = vpow2.f32 %v258_v27 }
  0x28   : > { %v494_v28 = vpop.eup %493 }
  0x29   : > { %v496_v29 = vpop.eup %495  ;;  %v260_v30 = vsel %vm239_vm0, %v494_v28, 0.0 }
  0x2a   : > { %v267_v31 = vsel %vm239_vm0, %v496_v29, 0.0  ;;  %v261_v32 = vrot.slane %v260_v30, 4 }
  0x2b   : > { %v268_v33 = vrot.slane %v267_v31, 4 }
  0x2c   : > { %v262_v34 = vadd.f32 %v261_v32, %v260_v30 }
  0x2d   : > { %v269_v35 = vadd.f32 %v268_v33, %v267_v31 }
  0x2e   : > { %v263_v36 = vrot.slane %v262_v34, 2 }
  0x2f   : > { %v270_v37 = vrot.slane %v269_v35, 2 }
  0x30   : > { %v264_v38 = vadd.f32 %v263_v36, %v262_v34 }
  0x31   : > { %v271_v39 = vadd.f32 %v270_v37, %v269_v35 }
  0x32   : > { %v265_v40 = vrot.slane %v264_v38, 1 }
  0x33   : > { %v272_v41 = vrot.slane %v271_v39, 1 }
  0x34   : > { %v266_v42 = vadd.f32 %v265_v40, %v264_v38 }
  0x35   : > { %v273_v43 = vadd.f32 %v272_v41, %v271_v39 }
  0x36   : > { %497 = vlog2.f32 %v266_v42 }
  0x37   : > { %499 = vlog2.f32 %v273_v43 }
  0x3c   : > { %v498_v50 = vpop.eup %497 }
  0x3d   : > { %v500_v51 = vpop.eup %499  ;;  %v275_v60 = vmul.f32 0.6931472, %v498_v50 }
  0x3e   : > { %v277_v61 = vmul.f32 0.6931472, %v500_v51 }
  0x3f   : > { %v278_v1 = vsub.f32 %v585_v24, %v275_v60 }
  0x40   : > { %v279_v2 = vsub.f32 %v587_v25, %v277_v61 }
  0x6a   : > { %v316_v49 = vpop.permute.xlu2 %315 }
  0x73   : > { %v324_v62 = vpop.permute.xlu2 %323 }
  0x80   : > { %v300_v44 = vpop.permute.xlu1 %299  ;;  %v286_v45 = vpop.permute.xlu0 %285 }
  0x89   : > { %v308_v52 = vpop.permute.xlu1 %307  ;;  %v292_v53 = vpop.permute.xlu0 %291 }
  0x8a   : > { %v294_v54 = vsel %vm288_vm1, %v292_v53, %v286_v45  ;;  %v295_v55 = vsel %vm289_vm2, %v292_v53, %v286_v45 }
  0x8b   : > { %v302_v56 = vsel %vm296_vm3, %v300_v44, %v294_v54  ;;  %v303_v57 = vsel %vm297_vm4, %v300_v44, %v295_v55 }
  0x8c   : > { %v310_v58 = vsel %vm304_vm5, %v308_v52, %v302_v56  ;;  %v311_v59 = vsel %vm305_vm6, %v308_v52, %v303_v57 }
  0x8d   : > { %v318_v63 = vsel %vm312_vm7, %v316_v49, %v310_v58  ;;  %v319_v0 = vsel %vm313_vm8, %v316_v49, %v311_v59 }
  0x8e   : > { %v326_v3 = vsel %vm320_vm9, %v324_v62, %v318_v63  ;;  %v327_v4 = vsel %vm321_vm10, %v324_v62, %v319_v0 }
  0x92   : > { %v332_v5 = vpop.permute.xlu1 %331 }
  0x93   : > { %v334_v6 = vsel %vm328_vm11, %v332_v5, %v326_v3  ;;  %v335_v7 = vsel %vm329_vm12, %v332_v5, %v327_v4 }
  0x94   : > { %v336_v8 = vmul.f32 %v334_v6, %v278_v1  ;;  %v337_v9 = vmul.f32 %v335_v7, %v279_v2 }
  0x96   : > { %v338_v10 = vsel %vm239_vm0, %v336_v8, 0.0  ;;  %v345_v11 = vsel %vm239_vm0, %v337_v9, 0.0 }
  0x97   : > { %v339_v12 = vrot.slane %v338_v10, 4  ;;  %v346_v13 = vrot.slane %v345_v11, 4 }
  0x99   : > { %v340_v14 = vadd.f32 %v339_v12, %v338_v10  ;;  %v347_v15 = vadd.f32 %v346_v13, %v345_v11 }
  0x9b   : > { %v341_v16 = vrot.slane %v340_v14, 2  ;;  %v348_v17 = vrot.slane %v347_v15, 2 }
  0x9d   : > { %v342_v18 = vadd.f32 %v341_v16, %v340_v14  ;;  %v349_v19 = vadd.f32 %v348_v17, %v347_v15 }
  0x9f   : > { %v343_v20 = vrot.slane %v342_v18, 1  ;;  %v350_v21 = vrot.slane %v349_v19, 1 }
  0xa1   : > { %v344_v22 = vadd.f32 %v343_v20, %v342_v18  ;;  %v351_v23 = vadd.f32 %v350_v21, %v349_v19 }
  0xa3   : > { %v352_v24 = vadd.f32 %v351_v23, %v344_v22 }
  0xa5   : > { %353 = vadd.xlane.f32.xlu2 %v352_v24 }
 0x118   : > { %v354_v25 = vpop.xlane.xlu2 %353 }
 0x119   : > { %356 = vst.msk [vmem:[%s235_s28] sm:$0x1] %vm355_vm13, %v354_v25 }
 0x11a PF: > { %s13_s14 = sadd.s32 1, %s523_s14   ;;  %s618_s12 = smov %s519_s13 }
 0x11b   : > { %p10_p5 = scmp.ge.s32.totalorder %s13_s14, 4   ;;  %s619_s13 = smov %s621_s15 }
 0x11d   :  { %12 = sbr.rel (!%p10_p5) target bundleno = 2 (0x2), region = 65 }

</bundles_post_ra>
